<compile_context>
chip_gen: v5e
topology: v5e:2x2
jax: 0.10.0
libtpu: 0.0.40
codegen_flags: <defaults>
</compile_context>

<pallas_src>
import functools

import jax
import jax.numpy as jnp
from jax.experimental import pallas as pl
from jax.experimental.pallas import tpu as pltpu


# Effectively -inf for padded logit columns: exp(_NEG_BIG - m) underflows to exactly 0,
# so softmax normalization over the real columns is unchanged.  NOTE: deliberately NOT
# scaled by 1/beta (avoids -inf / NaN paths for tiny beta); padded columns must simply
# stay "very negative".
_NEG_BIG = -1e30

_TARGET_STEP_BYTES = 4 << 20  # aim for >= ~4 MiB of HBM traffic per grid step


def _round_up(v, m):
    return (v + m - 1) // m * m


def _cdiv(a, b):
    return -(-a // b)


def _sublane_rows(dtype):
    # Min second-minor tiling: 8 rows for 4-byte, 16 for 2-byte, 32 for 1-byte dtypes.
    return max(8, 32 // jnp.dtype(dtype).itemsize)


def _vmem_budget_bytes():
    """Generation-aware scoped-VMEM budget."""
    cap = None
    try:
        cap = getattr(pltpu.get_tpu_info(), "vmem_capacity_bytes", None)
    except Exception:
        cap = None
    if cap is None:
        cap = 64 << 20               # conservative (v7x-sized) fallback
    if cap >= (128 << 20):           # v5e / v6e: 128 MiB physical VMEM
        return 96 << 20
    return 48 << 20                  # v7x: 64 MiB physical VMEM


def _select_tiling(N, d_in, d_out_p, act_itemsize, w_itemsize, sublane):
    """Pick (row_tile, n_blocks, N_pad, vmem_limit_bytes)."""
    n_sub = _round_up(max(N, 1), sublane)
    d_in_vmem = _round_up(d_in, 128)          # lane padding of the X tile inside VMEM
    budget = _vmem_budget_bytes()

    # Resident operands (intended single-buffered via pl.Buffered(1)).
    w_bytes = _round_up(max(d_in, 1), sublane) * d_out_p * w_itemsize
    b_bytes = 8 * d_out_p * 4
    # Double-buffered X and OUT tiles, per row of tile.
    per_row = 2 * (d_in_vmem + d_out_p) * act_itemsize

    avail = budget - w_bytes - b_bytes - (4 << 20)   # slack for internal scratch
    max_rows = max(sublane, (max(avail, per_row) // per_row) // sublane * sublane)

    # Rows needed so one step moves >= ~4 MiB of HBM traffic (X read + OUT write).
    traffic_rows = _TARGET_STEP_BYTES // max(1, (d_in + d_out_p) * act_itemsize)
    traffic_rows = max(sublane, _round_up(traffic_rows, sublane))

    desired = max(sublane, min(n_sub, max_rows, traffic_rows))
    desired = desired // sublane * sublane

    n_blocks = _cdiv(n_sub, desired)
    if n_sub >= 2 * sublane:
        n_blocks = max(n_blocks, 2)          # give both v7x TensorCores work
    if n_blocks > 1 and n_blocks % 2:
        n_blocks += 1                        # even row split across the two cores
    row_tile = min(max_rows, _round_up(_cdiv(n_sub, n_blocks), sublane))
    n_blocks = _cdiv(n_sub, row_tile)        # final block count implied by the tile
    N_pad = n_blocks * row_tile

    vmem_needed = 2 * row_tile * (d_in_vmem + d_out_p) * act_itemsize + w_bytes + b_bytes
    # +w_bytes headroom also covers the double-buffered-weight fallback path.
    vmem_limit = int(min(budget, max(vmem_needed + w_bytes + (4 << 20), 32 << 20)))
    return row_tile, n_blocks, N_pad, vmem_limit


def gate_kernel(x_ref, w_ref, b_ref, o_ref, *, scale):
    # x_ref: (tm, d_in)          activation row tile (true, unpadded feature dim)
    # w_ref: (d_in, d_out_p)     pre-transposed, pre-scaled by 1/beta, zero-padded cols
    # b_ref: (1, d_out_p) f32    real cols = b/beta, padded cols = _NEG_BIG
    z = jnp.dot(x_ref[...], w_ref[...], preferred_element_type=jnp.float32)
    z = z + b_ref[...]
    m = jnp.max(z, axis=-1, keepdims=True)            # stable softmax (f32)
    e = jnp.exp(z - m)
    denom = jnp.sum(e, axis=-1, keepdims=True)
    inv = scale * pl.reciprocal(denom, approx=True)    # EUP; d_output folded in (narrow mul)
    o_ref[...] = (e * inv).astype(o_ref.dtype)


def gate_prepare(w, b, *, beta=1.0, param_dtype=None):
    """One-time weight preprocessing (hoist out of the per-call path).

    Returns (wt, b2, d_out): wt is (d_in, d_out_p) = (W/beta)^T zero-padded to a
    lane-dense output dim; b2 is (1, d_out_p) f32 with b/beta in the real columns
    and _NEG_BIG in the padded columns.
    """
    d_out, d_in = w.shape
    d_out_p = _round_up(d_out, 128)
    dt = w.dtype if param_dtype is None else param_dtype
    inv_beta = 1.0 / float(beta)

    wt = jnp.zeros((d_in, d_out_p), dtype=dt)
    wt = wt.at[:, :d_out].set((w.T * inv_beta).astype(dt))
    b2 = jnp.full((1, d_out_p), _NEG_BIG, dtype=jnp.float32)
    b2 = b2.at[0, :d_out].set(b.astype(jnp.float32) * inv_beta)
    return wt, b2, d_out


def gate_forward_prepared(x, wt, b2, d_out):
    """x: (B, S, d_input); wt/b2 from gate_prepare."""
    B, S, d_in = x.shape
    d_out_p = wt.shape[1]
    N = B * S

    x2 = x.reshape(N, d_in)                      # feature dim left unpadded in HBM
    act_itemsize = jnp.dtype(x.dtype).itemsize
    w_itemsize = jnp.dtype(wt.dtype).itemsize
    sublane = _sublane_rows(x.dtype)

    row_tile, n_blocks, N_pad, vmem_limit = _select_tiling(
        N, d_in, d_out_p, act_itemsize, w_itemsize, sublane)
    if N_pad != N:
        x2 = jnp.pad(x2, ((0, N_pad - N), (0, 0)))

    kernel = functools.partial(gate_kernel, scale=float(d_out))
    cost = pl.CostEstimate(
        flops=2 * N_pad * d_in * d_out_p,
        transcendentals=N_pad * d_out_p,
        bytes_accessed=(N_pad * d_in + N_pad * d_out_p) * act_itemsize
        + d_in * d_out_p * w_itemsize + d_out_p * 4,
    )

    def build(resident_single_buffered):
        # Constant-index resident operands gain nothing from double-buffering.
        opt = {"pipeline_mode": pl.Buffered(1)} if resident_single_buffered else {}
        return pl.pallas_call(
            kernel,
            out_shape=jax.ShapeDtypeStruct((N_pad, d_out_p), x.dtype),
            grid_spec=pltpu.PrefetchScalarGridSpec(
                num_scalar_prefetch=0,
                grid=(n_blocks,),
                in_specs=[
                    pl.BlockSpec((row_tile, d_in), lambda i: (i, 0)),          # X row tile
                    pl.BlockSpec((d_in, d_out_p), lambda i: (0, 0), **opt),    # resident W^T
                    pl.BlockSpec((1, d_out_p), lambda i: (0, 0), **opt),       # resident bias
                ],
                out_specs=pl.BlockSpec((row_tile, d_out_p), lambda i: (i, 0)),  # lane-dense
            ),
            compiler_params=pltpu.CompilerParams(
                dimension_semantics=("parallel",),
                vmem_limit_bytes=vmem_limit,
            ),
            cost_estimate=cost,
        )

    try:
        out2 = build(True)(x2, wt, b2)
    except Exception:
        # Fallback if single-buffering via pl.Buffered(1) is rejected on this jax build.
        out2 = build(False)(x2, wt, b2)

    return out2[:N, :d_out].reshape(B, S, d_out)


def gate_forward(x, w, b, *, beta=1.0):
    """Convenience one-shot path (prepares params every call)."""
    wt, b2, d_out = gate_prepare(w, b, beta=beta, param_dtype=x.dtype)
    return gate_forward_prepared(x, wt, b2, d_out)


def gate_reference(x, w, b, *, beta=1.0):
    d_out = w.shape[0]
    z = jnp.einsum("bsd,od->bso", x, w) + b
    return d_out * jax.nn.softmax(z / beta, axis=-1)


if __name__ == "__main__":
    # Small shapes: batch=2, seq=8, d_input=32, d_output=16
    B, S, d_input, d_output = 2, 8, 32, 16
    beta = 1.0

    key = jax.random.PRNGKey(0)
    kx, kw, kb = jax.random.split(key, 3)

    x = jax.random.normal(kx, (B, S, d_input), dtype=jnp.float32)

    # Deterministic init matching nn.Linear's default bounds
    bound = 1.0 / (d_input ** 0.5)
    w = jax.random.uniform(kw, (d_output, d_input), minval=-bound, maxval=bound,
                           dtype=jnp.float32)
    b = jax.random.uniform(kb, (d_output,), minval=-bound, maxval=bound,
                           dtype=jnp.float32)

    # One-time weight preprocessing hoisted out of the forward call.
    wt, b2, d_out = gate_prepare(w, b, beta=beta, param_dtype=x.dtype)
    out = gate_forward_prepared(x, wt, b2, d_out)
    out = jax.block_until_ready(out)

    ref = gate_reference(x, w, b, beta=beta)
    assert out.shape == (B, S, d_output), out.shape
    # approx=True reciprocal (EUP) is slightly looser than an exact divide
    assert jnp.allclose(out, ref, atol=5e-3, rtol=5e-3), float(jnp.max(jnp.abs(out - ref)))
    # gate rows must sum to d_output
    assert jnp.allclose(out.sum(-1), float(d_output), atol=5e-2), "row sums off"

    print("KERNEL_OK")
</pallas_src>

<mosaic_0001>
module attributes {stable_mosaic.version = 11 : i64} {
  func.func @gate_kernel(%arg0: i32, %arg1: memref<8x32xf32, #tpu.memory_space<vmem>>, %arg2: memref<32x128xf32, #tpu.memory_space<vmem>>, %arg3: memref<1x128xf32, #tpu.memory_space<vmem>>, %arg4: memref<8x128xf32, #tpu.memory_space<vmem>>) attributes {dimension_semantics = [#tpu.dimension_semantics<parallel>], iteration_bounds = array<i64: 2>, scalar_prefetch = 0 : i64, scratch_operands = 0 : i64, tpu.core_type = #tpu.core_type<tc>, window_params = [{transform_indices = @transform_0, window_bounds = array<i64: 8, 32>}, {pipeline_mode = #tpu.pipeline_mode<synchronous>, transform_indices = @transform_1, window_bounds = array<i64: 32, 128>}, {pipeline_mode = #tpu.pipeline_mode<synchronous>, transform_indices = @transform_2, window_bounds = array<i64: 1, 128>}, {transform_indices = @transform_3, window_bounds = array<i64: 8, 128>}]} {
    %c0 = arith.constant 0 : index
    %c0_0 = arith.constant 0 : index
    %0 = vector.load %arg1[%c0, %c0_0] : memref<8x32xf32, #tpu.memory_space<vmem>>, vector<8x32xf32>
    %c0_1 = arith.constant 0 : index
    %c0_2 = arith.constant 0 : index
    %1 = vector.load %arg2[%c0_1, %c0_2] : memref<32x128xf32, #tpu.memory_space<vmem>>, vector<32x128xf32>
    %cst = arith.constant dense<0.000000e+00> : vector<8x128xf32>
    %2 = tpu.matmul %0, %1, %cst {dimension_numbers = #tpu.dot_dimension_numbers<[1], [0], [0], [1], [0, 0, 1, 1], [], []>} : vector<8x32xf32>, vector<32x128xf32>, vector<8x128xf32> -> vector<8x128xf32>
    %c0_3 = arith.constant 0 : index
    %c0_4 = arith.constant 0 : index
    %3 = vector.load %arg3[%c0_3, %c0_4] : memref<1x128xf32, #tpu.memory_space<vmem>>, vector<1x128xf32>
    %4 = vector.broadcast %3 : vector<1x128xf32> to vector<8x128xf32>
    %5 = arith.addf %2, %4 : vector<8x128xf32>
    %cst_5 = arith.constant dense<0xFF800000> : vector<8xf32>
    %6 = vector.multi_reduction <maximumf>, %5, %cst_5 [1] : vector<8x128xf32> to vector<8xf32>
    %7 = vector.shape_cast %6 : vector<8xf32> to vector<8x1xf32>
    %8 = vector.broadcast %7 : vector<8x1xf32> to vector<8x128xf32>
    %9 = arith.subf %5, %8 : vector<8x128xf32>
    %10 = math.exp %9 : vector<8x128xf32>
    %cst_6 = arith.constant dense<0.000000e+00> : vector<8xf32>
    %11 = vector.multi_reduction <add>, %10, %cst_6 [1] : vector<8x128xf32> to vector<8xf32>
    %12 = vector.shape_cast %11 : vector<8xf32> to vector<8x1xf32>
    %13 = tpu.reciprocal %12 {approx = true} : vector<8x1xf32> -> vector<8x1xf32>
    %cst_7 = arith.constant 1.600000e+01 : f32
    %14 = vector.broadcast %cst_7 : f32 to vector<8x1xf32>
    %15 = arith.mulf %14, %13 : vector<8x1xf32>
    %16 = vector.broadcast %15 : vector<8x1xf32> to vector<8x128xf32>
    %17 = arith.mulf %10, %16 : vector<8x128xf32>
    %c0_8 = arith.constant 0 : index
    %c0_9 = arith.constant 0 : index
    %18 = vector.load %arg4[%c0_8, %c0_9] : memref<8x128xf32, #tpu.memory_space<vmem>>, vector<8x128xf32>
    tpu.vector_store %arg4[%c0_8, %c0_9], %17 {strides = array<i32>} : memref<8x128xf32, #tpu.memory_space<vmem>>, vector<8x128xf32>,
    return
  }
  func.func @transform_0(%arg0: i32) -> (i32, i32) {
    %c0_i32 = arith.constant 0 : i32
    %c0_i32_0 = arith.constant 0 : i32
    return %arg0, %c0_i32 : i32, i32
  }
  func.func @transform_1(%arg0: i32) -> (i32, i32) {
    %c0_i32 = arith.constant 0 : i32
    %c0_i32_0 = arith.constant 0 : i32
    %c0_i32_1 = arith.constant 0 : i32
    return %c0_i32, %c0_i32_0 : i32, i32
  }
  func.func @transform_2(%arg0: i32) -> (i32, i32) {
    %c0_i32 = arith.constant 0 : i32
    %c0_i32_0 = arith.constant 0 : i32
    %c0_i32_1 = arith.constant 0 : i32
    return %c0_i32, %c0_i32_0 : i32, i32
  }
  func.func @transform_3(%arg0: i32) -> (i32, i32) {
    %c0_i32 = arith.constant 0 : i32
    %c0_i32_0 = arith.constant 0 : i32
    return %arg0, %c0_i32 : i32, i32
  }
}

module attributes {stable_mosaic.version = 11 : i64} {
  func.func @gate_kernel(%arg0: i32, %arg1: memref<8x32xf32, #tpu.memory_space<vmem>>, %arg2: memref<32x128xf32, #tpu.memory_space<vmem>>, %arg3: memref<1x128xf32, #tpu.memory_space<vmem>>, %arg4: memref<8x128xf32, #tpu.memory_space<vmem>>) attributes {dimension_semantics = [#tpu.dimension_semantics<parallel>], iteration_bounds = array<i64: 2>, scalar_prefetch = 0 : i64, scratch_operands = 0 : i64, tpu.core_type = #tpu.core_type<tc>, window_params = [{transform_indices = @transform_0, window_bounds = array<i64: 8, 32>}, {pipeline_mode = #tpu.pipeline_mode<synchronous>, transform_indices = @transform_1, window_bounds = array<i64: 32, 128>}, {pipeline_mode = #tpu.pipeline_mode<synchronous>, transform_indices = @transform_2, window_bounds = array<i64: 1, 128>}, {transform_indices = @transform_3, window_bounds = array<i64: 8, 128>}]} {
    %c0 = arith.constant 0 : index
    %c0_0 = arith.constant 0 : index
    %0 = vector.load %arg1[%c0, %c0_0] : memref<8x32xf32, #tpu.memory_space<vmem>>, vector<8x32xf32>
    %c0_1 = arith.constant 0 : index
    %c0_2 = arith.constant 0 : index
    %1 = vector.load %arg2[%c0_1, %c0_2] : memref<32x128xf32, #tpu.memory_space<vmem>>, vector<32x128xf32>
    %cst = arith.constant dense<0.000000e+00> : vector<8x128xf32>
    %2 = tpu.matmul %0, %1, %cst {dimension_numbers = #tpu.dot_dimension_numbers<[1], [0], [0], [1], [0, 0, 1, 1], [], []>} : vector<8x32xf32>, vector<32x128xf32>, vector<8x128xf32> -> vector<8x128xf32>
    %c0_3 = arith.constant 0 : index
    %c0_4 = arith.constant 0 : index
    %3 = vector.load %arg3[%c0_3, %c0_4] : memref<1x128xf32, #tpu.memory_space<vmem>>, vector<1x128xf32>
    %4 = vector.broadcast %3 : vector<1x128xf32> to vector<8x128xf32>
    %5 = arith.addf %2, %4 : vector<8x128xf32>
    %cst_5 = arith.constant dense<0xFF800000> : vector<8xf32>
    %6 = vector.multi_reduction <maximumf>, %5, %cst_5 [1] : vector<8x128xf32> to vector<8xf32>
    %7 = vector.shape_cast %6 : vector<8xf32> to vector<8x1xf32>
    %8 = vector.broadcast %7 : vector<8x1xf32> to vector<8x128xf32>
    %9 = arith.subf %5, %8 : vector<8x128xf32>
    %10 = math.exp %9 : vector<8x128xf32>
    %cst_6 = arith.constant dense<0.000000e+00> : vector<8xf32>
    %11 = vector.multi_reduction <add>, %10, %cst_6 [1] : vector<8x128xf32> to vector<8xf32>
    %12 = vector.shape_cast %11 : vector<8xf32> to vector<8x1xf32>
    %13 = tpu.reciprocal %12 {approx = true} : vector<8x1xf32> -> vector<8x1xf32>
    %cst_7 = arith.constant 1.600000e+01 : f32
    %14 = vector.broadcast %cst_7 : f32 to vector<8x1xf32>
    %15 = arith.mulf %14, %13 : vector<8x1xf32>
    %16 = vector.broadcast %15 : vector<8x1xf32> to vector<8x128xf32>
    %17 = arith.mulf %10, %16 : vector<8x128xf32>
    %c0_8 = arith.constant 0 : index
    %c0_9 = arith.constant 0 : index
    %18 = vector.load %arg4[%c0_8, %c0_9] : memref<8x128xf32, #tpu.memory_space<vmem>>, vector<8x128xf32>
    tpu.vector_store %arg4[%c0_8, %c0_9], %17 {strides = array<i32>} : memref<8x128xf32, #tpu.memory_space<vmem>>, vector<8x128xf32>,
    return
  }
  func.func @transform_0(%arg0: i32) -> (i32, i32) {
    %c0_i32 = arith.constant 0 : i32
    %c0_i32_0 = arith.constant 0 : i32
    return %arg0, %c0_i32 : i32, i32
  }
  func.func @transform_1(%arg0: i32) -> (i32, i32) {
    %c0_i32 = arith.constant 0 : i32
    %c0_i32_0 = arith.constant 0 : i32
    %c0_i32_1 = arith.constant 0 : i32
    return %c0_i32, %c0_i32_0 : i32, i32
  }
  func.func @transform_2(%arg0: i32) -> (i32, i32) {
    %c0_i32 = arith.constant 0 : i32
    %c0_i32_0 = arith.constant 0 : i32
    %c0_i32_1 = arith.constant 0 : i32
    return %c0_i32, %c0_i32_0 : i32, i32
  }
  func.func @transform_3(%arg0: i32) -> (i32, i32) {
    %c0_i32 = arith.constant 0 : i32
    %c0_i32_0 = arith.constant 0 : i32
    return %arg0, %c0_i32 : i32, i32
  }
}

</mosaic_0001>

<bundles_post_ra>
// kernel: tpu_custom_call.1
= control target key start
LH: loop header
LB: loop body
LE: loop exit
PB: predicated region body
PF: predicated region fallthrough
CT: control target
= control target key end

     0   :  { %8 = vsyncpa [#allocation3], 0  ;;  %s722_s0 = inlined_call_operand.hbm [shape: f32[16,32], index: 0, kind: input, shape index: {}]   ;;  %s723_s1 = inlined_call_operand.hbm [shape: f32[32,128], index: 1, kind: input, shape index: {}]   ;;  %s724_s2 = inlined_call_operand.vmem [shape: f32[1,128], index: 2, kind: input, shape index: {}]   ;;  %s725_s3 = inlined_call_operand.hbm [shape: f32[16,128], index: 3, kind: output, shape index: {}]  }
   0x1   :  { %10 = vsyncpa [#allocation3 + $0x1], 0 }
   0x2   :  { %11 = vsyncpa [#allocation6], 0 }
   0x3   :  { %12 = vsyncpa [#allocation4], 0 }
   0x4   :  { %14 = vsyncpa [#allocation4 + $0x1], 0  ;;  %s579_s12 = smov 0   ;;  %s581_s13 = smov 0  }
   0x5   :  { %s583_s14 = smov 0   ;;  %s585_s15 = smov 0  }
   0x6 LB: > { %s130_s18 = sshll.u32 %s723_s1, 4  ;;  %s603_s19 = sadd.s32 4294967295, %s554_s15   ;;  %s554_s15 = sphi %s585_s15, %s735_s15   ;;  %s550_s14 = sphi %s583_s14, %s734_s14   ;;  %s546_s13 = sphi %s581_s13, %s733_s13   ;;  %s542_s12 = sphi %s579_s12, %s732_s12   ;;  %s131_s18 = int_to_ptr.hbm [resolvable:$true] %s130_s18 }
   0x7   : > { %p346_p0 = scmp.ge.s32.totalorder %s554_s15, 1  ;;  %p41_p1 = scmp.eq.s32.totalorder %s603_s19, 0 }
   0x8   : > { %p119_p2 = scmp.lt.s32.totalorder %s554_s15, 3  ;;  %s556_s21 = smov [#allocation5]  }
   0x9   : > { %s132_s22 = sshll.u32 %s556_s21, 4  ;;  %s557_s23 = smov 128   ;;  %s133_s22 = int_to_ptr.vmem [resolvable:$true] %s132_s22 }
   0xa   : > { %p608_p3 = pnand %p346_p0, %p119_p2  ;;  %s558_s24 = smov 8  }
   0xb   : > { %s345_s25 = sadd.s32 4294967294, %s554_s15   ;;  %s619_s26 = sadd.s32 1, %s554_s15  }
   0xc   : > { %p368_p4 = pneg %p608_p3  ;;  %s27_s27 = sadd.s32 1, %s550_s14 }
   0xd   : > { %s24_s28 = ssub.s32 %s554_s15, %s619_s26  ;;  %p34_p7 = scmp.ne.s32.totalorder %s550_s14, %s546_s13 }
   0xe   : > { %p369_p6 = pnand %p368_p4, %p41_p1  ;;  %p25_p8 = scmp.eq.s32.totalorder %s24_s28, 0 }
   0xf   : > { %p35_p9 = scmp.eq.s32.totalorder %s554_s15, 0  ;;  %p40_p10 = scmp.ne.s32.totalorder %s546_s13, %s542_s12 }
  0x10   : > { %371 = dma.hbm_to_vmem [thread:$0]  (!%p369_p6), %s131_s18, 512, %s133_s22, [#allocation6], %s557_s23, %s557_s23, %s558_s24  }
  0x11   : > { %p106_p11 = scmp.eq.s32.totalorder %s603_s19, 1  ;;  %p635_p12 = por %p41_p1, %p40_p10 }
  0x12   : > { %s631_s29 = scalar_select %p25_p8, %s550_s14, %s27_s27  }
  0x13   : > { %p639_p13 = por %p106_p11, %p34_p7  ;;  %p112_p0 = scmp.eq.s32.totalorder %s345_s25, 1 }
  0x14   : > { %p36_p2 = por %p35_p9, %p34_p7  ;;  %s149_s5 = sand.u32 1, %s550_s14  }
  0x15   : > { %p644_p4 = por %p112_p0, %p40_p10  ;;  %p381_p6 = scmp.lt.s32.totalorder %s554_s15, 2 }
  0x16   : > { %s349_s7 = sshll.u32 %s149_s5, 3  ;;  %s350_s8 = sshll.u32 %s554_s15, 3 }
  0x17   : > { %s157_s11 = scalar_lea.hbm %s722_s0, %s350_s8  ;;  %s153_s17 = scalar_lea.vmem [#allocation2], %s349_s7 }
  0x18   : > { %s159_s16 = sshll.u32 %s157_s11, 4  ;;  %s161_s18 = sshll.u32 %s153_s17, 4  ;;  %s160_s16 = int_to_ptr.hbm [resolvable:$true] %s159_s16  ;;  %s162_s18 = int_to_ptr.vmem [resolvable:$true] %s161_s18 }
  0x19   : > { %p653_p8 = pnand %p381_p6, %p36_p2  ;;  %s150_s22 = scalar_lea.sflag [#allocation3], %s149_s5 }
  0x1a   : > { %s454_s23 = sshra.s32 %s160_s16, 4  ;;  %s461_s28 = scalar_lea.hbm %s722_s0, 16  ;;  %s455_s23 = int_to_ptr.hbm [resolvable:$true] %s454_s23 }
  0x1b   : > { %s456_s24 = scalar_lea.hbm %s455_s23, 8  ;;  %p458_p9 = pneg %p653_p8 }
  0x1c   : > { %p457_p7 = scmp.ne.s32.totalorder %s455_s23, %s456_s24  ;;  %p462_p0 = scmp.lt.s32.totalorder %s455_s23, %s722_s0 }
  0x1d   : > { %p463_p2 = scmp.lt.s32.totalorder %s461_s28, %s456_s24 }
  0x1e   : > { %p459_p10 = pnand %p458_p9, %p457_p7 }
  0x1f   : > { %p464_p6 = por %p463_p2, %p462_p0 }
  0x20   : > { %p460_p11 = pneg %p459_p10 }
  0x22   : > { %p465_p5 = pnand %p464_p6, %p460_p11 }
  0x24   : > { %468 = shalt.err (!%p465_p5)
}
  0x25   : > { %375 = dma.hbm_to_vmem [thread:$0]  (!%p653_p8), %s160_s16, 128, %s162_s18, %s150_s22  }
  0x26   : > { %170 = sbr.rel (%p608_p3) target bundleno = 439 (0x1b7), region = 32  ;;  %s670_s5 = sand.u32 (!%p608_p3), 1, %s546_s13  }
  0x27   : > { %s352_s9 = sshll.u32 (!%p608_p3), %s670_s5, 3  ;;  %s173_s10 = scalar_lea.sflag (!%p608_p3), [#allocation3], %s670_s5 }
  0x28   : > { %s176_s11 = scalar_lea.vmem (!%p608_p3), [#allocation2], %s352_s9 }
  0x2b   : > { %529 = dma.done.wait (%p635_p12), %s173_s10, 128  }
  0x2c   : > { %531 = vsyncadd (%p635_p12), %s173_s10, 4294967168 }
  0x2d   : > { %533 = dma.done.wait (%p41_p1), [#allocation6], 512  }
  0x2e   : > { %535 = vsyncadd (%p41_p1), [#allocation6], 4294966784  ;;  %v209_v0 = vld [vmem:[#allocation5 + $0x18] sm:$0xff]  ;;  %v208_v1 = vld [vmem:[#allocation5 + $0x10] sm:$0xff]  ;;  %vm214_vm0 = vcmask 261120   ;;  %s357_s16 = sshll.u32 %s603_s19, 3 }
  0x2f   : > { %230 = vmatpush.msra.mxu0 %v209_v0  ;;  %v207_v2 = vld [vmem:[#allocation5 + $0x8] sm:$0xff]  ;;  %v206_v3 = vld [vmem:[#allocation5] sm:$0xff]  ;;  %v205_v4 = vld [vmem:[%s176_s11] sm:$0xff]  ;;  %s260_s21 = scalar_lea.hbm %s725_s3, %s357_s16  ;;  %s204_s22 = scalar_lea.vmem [#allocation7], %s352_s9 }
  0x30   : > { %v419_v5 = vld [vmem:[%s724_s2] ss:$0 sm:$0xff]  ;;  %s262_s23 = sshll.u32 %s204_s22, 4  ;;  %s264_s24 = sshll.u32 %s260_s21, 4  ;;  %s263_s23 = int_to_ptr.vmem [resolvable:$true] %s262_s23  ;;  %s265_s24 = int_to_ptr.hbm [resolvable:$true] %s264_s24 }
  0x31   : > { %231 = vmatpush.msra.mxu0 %v208_v1  ;;  %s250_s25 = scalar_lea.sflag [#allocation4], %s670_s5  ;;  %s498_s27 = sshra.s32 %s265_s24, 4  ;;  %s499_s27 = int_to_ptr.hbm [resolvable:$true] %s498_s27 }
  0x32   : > { %s500_s28 = scalar_lea.hbm %s499_s27, 8  ;;  %s504_s8 = scalar_lea.hbm %s725_s3, 16 }
  0x33   : > { %232 = vmatpush.msra.mxu0 %v207_v2  ;;  %p501_p1 = scmp.ne.s32.totalorder %s499_s27, %s500_s28  ;;  %p505_p12 = scmp.lt.s32.totalorder %s499_s27, %s725_s3 }
  0x34   : > { %p506_p8 = scmp.lt.s32.totalorder %s504_s8, %s500_s28 }
  0x35   : > { %233 = vmatpush.msra.mxu0 %v206_v3  ;;  %p502_p3 = pnand %p501_p1, %p639_p13 }
  0x36   : > { %355 = vmatmul.msk.f32.vlgmr.msra.gmra.mxu0 %vm214_vm0, %v205_v4  ;;  %p507_p7 = por %p506_p8, %p505_p12 }
  0x37   : > { %p503_p5 = pneg %p502_p3 }
  0x39   : > { %p508_p9 = pnand %p507_p7, %p503_p5 }
  0xb3   : > { %v235_v6 = vpop.f32.mrf.mxu0 }
  0xb4   : > { %v236_v7 = vadd.f32 %v419_v5, %v235_v6 }
  0xb6   : > { %238 = vmax.xlane.f32.xlu0 %v236_v7 }
 0x129   : > { %v239_v8 = vpop.xlane.xlu0 %238 }
 0x12a   : > { %v240_v9 = vsub.f32 %v236_v7, %v239_v8 }
 0x12c   : > { %v241_v10 = vmul.f32 1.442695, %v240_v9 }
 0x12e   : > { %420 = vpow2.f32 %v241_v10 }
 0x134   : > { %v421_v11 = vpop.eup %420 }
 0x135   : > { %243 = vadd.xlane.f32.xlu0 %v421_v11 }
 0x1a8   : > { %v244_v12 = vpop.xlane.xlu0 %243 }
 0x1a9   : > { %422 = vrcp.f32 %v244_v12 }
 0x1af   : > { %v423_v13 = vpop.eup %422 }
 0x1b0   : > { %v246_v14 = vmul.f32 16.0, %v423_v13 }
 0x1b2   : > { %v247_v15 = vmul.f32 %v421_v11, %v246_v14 }
 0x1b4   : > { %248 = vst [vmem:[%s204_s22] sm:$0xff] %v247_v15 }
 0x1b5   : > { %511 = shalt.err (!%p508_p9)
}
 0x1b6   : > { %366 = dma.vmem_to_hbm [thread:$0]  (%p639_p13), %s263_s23, 128, %s265_s24, %s250_s25  }
 0x1b7 PF: > { %s276_s5 = sand.u32 1, %s542_s12   ;;  %p731_p10 = scmp.ge.s32.totalorder %s554_s15, 2 }
 0x1b8   : > { %s277_s11 = scalar_lea.sflag [#allocation4], %s276_s5 }
 0x1b9   : > { %p377_p11 = pnand %p731_p10, %p644_p4 }
 0x1bb   : > { %p378_p0 = pneg %p377_p11 }
 0x1bd   : > { %537 = dma.done.wait (%p378_p0), %s277_s11, 128  }
 0x1be   : > { %539 = vsyncadd (%p378_p0), %s277_s11, 4294967168  ;;  %p17_p2 = scmp.ge.s32.totalorder %s619_s26, 4   ;;  %s732_s12 = smov %s546_s13 }
 0x1bf   : > { %s733_s13 = smov %s550_s14  ;;  %s734_s14 = smov %s631_s29 }
 0x1c0   : > { %s735_s15 = smov %s619_s26  ;;  %19 = sbr.rel (!%p17_p2) target bundleno = 6 (0x6), region = 81 }
 0x1c5   :  { %283 = vsyncpa [#allocation3], 1 }
 0x1c6   :  { %285 = vsyncpa [#allocation3 + $0x1], 1 }
 0x1c7   :  { %286 = vsyncpa [#allocation6], 1 }
 0x1c8   :  { %287 = vsyncpa [#allocation4], 1 }
 0x1c9   :  { %289 = vsyncpa [#allocation4 + $0x1], 1 }

// kernel: tpu_custom_call.1
= control target key start
LH: loop header
LB: loop body
LE: loop exit
PB: predicated region body
PF: predicated region fallthrough
CT: control target
= control target key end

     0   :  { %8 = vsyncpa [#allocation3], 0  ;;  %s722_s0 = inlined_call_operand.hbm [shape: f32[16,32], index: 0, kind: input, shape index: {}]   ;;  %s723_s1 = inlined_call_operand.hbm [shape: f32[32,128], index: 1, kind: input, shape index: {}]   ;;  %s724_s2 = inlined_call_operand.vmem [shape: f32[1,128], index: 2, kind: input, shape index: {}]   ;;  %s725_s3 = inlined_call_operand.hbm [shape: f32[16,128], index: 3, kind: output, shape index: {}]  }
   0x1   :  { %10 = vsyncpa [#allocation3 + $0x1], 0 }
   0x2   :  { %11 = vsyncpa [#allocation6], 0 }
   0x3   :  { %12 = vsyncpa [#allocation4], 0 }
   0x4   :  { %14 = vsyncpa [#allocation4 + $0x1], 0  ;;  %s579_s12 = smov 0   ;;  %s581_s13 = smov 0  }
   0x5   :  { %s583_s14 = smov 0   ;;  %s585_s15 = smov 0  }
   0x6 LB: > { %s130_s18 = sshll.u32 %s723_s1, 4  ;;  %s603_s19 = sadd.s32 4294967295, %s554_s15   ;;  %s554_s15 = sphi %s585_s15, %s735_s15   ;;  %s550_s14 = sphi %s583_s14, %s734_s14   ;;  %s546_s13 = sphi %s581_s13, %s733_s13   ;;  %s542_s12 = sphi %s579_s12, %s732_s12   ;;  %s131_s18 = int_to_ptr.hbm [resolvable:$true] %s130_s18 }
   0x7   : > { %p346_p0 = scmp.ge.s32.totalorder %s554_s15, 1  ;;  %p41_p1 = scmp.eq.s32.totalorder %s603_s19, 0 }
   0x8   : > { %p119_p2 = scmp.lt.s32.totalorder %s554_s15, 3  ;;  %s556_s21 = smov [#allocation5]  }
   0x9   : > { %s132_s22 = sshll.u32 %s556_s21, 4  ;;  %s557_s23 = smov 128   ;;  %s133_s22 = int_to_ptr.vmem [resolvable:$true] %s132_s22 }
   0xa   : > { %p608_p3 = pnand %p346_p0, %p119_p2  ;;  %s558_s24 = smov 8  }
   0xb   : > { %s345_s25 = sadd.s32 4294967294, %s554_s15   ;;  %s619_s26 = sadd.s32 1, %s554_s15  }
   0xc   : > { %p368_p4 = pneg %p608_p3  ;;  %s27_s27 = sadd.s32 1, %s550_s14 }
   0xd   : > { %s24_s28 = ssub.s32 %s554_s15, %s619_s26  ;;  %p34_p7 = scmp.ne.s32.totalorder %s550_s14, %s546_s13 }
   0xe   : > { %p369_p6 = pnand %p368_p4, %p41_p1  ;;  %p25_p8 = scmp.eq.s32.totalorder %s24_s28, 0 }
   0xf   : > { %p35_p9 = scmp.eq.s32.totalorder %s554_s15, 0  ;;  %p40_p10 = scmp.ne.s32.totalorder %s546_s13, %s542_s12 }
  0x10   : > { %371 = dma.hbm_to_vmem [thread:$0]  (!%p369_p6), %s131_s18, 512, %s133_s22, [#allocation6], %s557_s23, %s557_s23, %s558_s24  }
  0x11   : > { %p106_p11 = scmp.eq.s32.totalorder %s603_s19, 1  ;;  %p635_p12 = por %p41_p1, %p40_p10 }
  0x12   : > { %s631_s29 = scalar_select %p25_p8, %s550_s14, %s27_s27  }
  0x13   : > { %p639_p13 = por %p106_p11, %p34_p7  ;;  %p112_p0 = scmp.eq.s32.totalorder %s345_s25, 1 }
  0x14   : > { %p36_p2 = por %p35_p9, %p34_p7  ;;  %s149_s5 = sand.u32 1, %s550_s14  }
  0x15   : > { %p644_p4 = por %p112_p0, %p40_p10  ;;  %p381_p6 = scmp.lt.s32.totalorder %s554_s15, 2 }
  0x16   : > { %s349_s7 = sshll.u32 %s149_s5, 3  ;;  %s350_s8 = sshll.u32 %s554_s15, 3 }
  0x17   : > { %s157_s11 = scalar_lea.hbm %s722_s0, %s350_s8  ;;  %s153_s17 = scalar_lea.vmem [#allocation2], %s349_s7 }
  0x18   : > { %s159_s16 = sshll.u32 %s157_s11, 4  ;;  %s161_s18 = sshll.u32 %s153_s17, 4  ;;  %s160_s16 = int_to_ptr.hbm [resolvable:$true] %s159_s16  ;;  %s162_s18 = int_to_ptr.vmem [resolvable:$true] %s161_s18 }
  0x19   : > { %p653_p8 = pnand %p381_p6, %p36_p2  ;;  %s150_s22 = scalar_lea.sflag [#allocation3], %s149_s5 }
  0x1a   : > { %s454_s23 = sshra.s32 %s160_s16, 4  ;;  %s461_s28 = scalar_lea.hbm %s722_s0, 16  ;;  %s455_s23 = int_to_ptr.hbm [resolvable:$true] %s454_s23 }
  0x1b   : > { %s456_s24 = scalar_lea.hbm %s455_s23, 8  ;;  %p458_p9 = pneg %p653_p8 }
  0x1c   : > { %p457_p7 = scmp.ne.s32.totalorder %s455_s23, %s456_s24  ;;  %p462_p0 = scmp.lt.s32.totalorder %s455_s23, %s722_s0 }
  0x1d   : > { %p463_p2 = scmp.lt.s32.totalorder %s461_s28, %s456_s24 }
  0x1e   : > { %p459_p10 = pnand %p458_p9, %p457_p7 }
  0x1f   : > { %p464_p6 = por %p463_p2, %p462_p0 }
  0x20   : > { %p460_p11 = pneg %p459_p10 }
  0x22   : > { %p465_p5 = pnand %p464_p6, %p460_p11 }
  0x24   : > { %468 = shalt.err (!%p465_p5)
}
  0x25   : > { %375 = dma.hbm_to_vmem [thread:$0]  (!%p653_p8), %s160_s16, 128, %s162_s18, %s150_s22  }
  0x26   : > { %170 = sbr.rel (%p608_p3) target bundleno = 439 (0x1b7), region = 32  ;;  %s670_s5 = sand.u32 (!%p608_p3), 1, %s546_s13  }
  0x27   : > { %s352_s9 = sshll.u32 (!%p608_p3), %s670_s5, 3  ;;  %s173_s10 = scalar_lea.sflag (!%p608_p3), [#allocation3], %s670_s5 }
  0x28   : > { %s176_s11 = scalar_lea.vmem (!%p608_p3), [#allocation2], %s352_s9 }
  0x2b   : > { %529 = dma.done.wait (%p635_p12), %s173_s10, 128  }
  0x2c   : > { %531 = vsyncadd (%p635_p12), %s173_s10, 4294967168 }
  0x2d   : > { %533 = dma.done.wait (%p41_p1), [#allocation6], 512  }
  0x2e   : > { %535 = vsyncadd (%p41_p1), [#allocation6], 4294966784  ;;  %v209_v0 = vld [vmem:[#allocation5 + $0x18] sm:$0xff]  ;;  %v208_v1 = vld [vmem:[#allocation5 + $0x10] sm:$0xff]  ;;  %vm214_vm0 = vcmask 261120   ;;  %s357_s16 = sshll.u32 %s603_s19, 3 }
  0x2f   : > { %230 = vmatpush.msra.mxu0 %v209_v0  ;;  %v207_v2 = vld [vmem:[#allocation5 + $0x8] sm:$0xff]  ;;  %v206_v3 = vld [vmem:[#allocation5] sm:$0xff]  ;;  %v205_v4 = vld [vmem:[%s176_s11] sm:$0xff]  ;;  %s260_s21 = scalar_lea.hbm %s725_s3, %s357_s16  ;;  %s204_s22 = scalar_lea.vmem [#allocation7], %s352_s9 }
  0x30   : > { %v419_v5 = vld [vmem:[%s724_s2] ss:$0 sm:$0xff]  ;;  %s262_s23 = sshll.u32 %s204_s22, 4  ;;  %s264_s24 = sshll.u32 %s260_s21, 4  ;;  %s263_s23 = int_to_ptr.vmem [resolvable:$true] %s262_s23  ;;  %s265_s24 = int_to_ptr.hbm [resolvable:$true] %s264_s24 }
  0x31   : > { %231 = vmatpush.msra.mxu0 %v208_v1  ;;  %s250_s25 = scalar_lea.sflag [#allocation4], %s670_s5  ;;  %s498_s27 = sshra.s32 %s265_s24, 4  ;;  %s499_s27 = int_to_ptr.hbm [resolvable:$true] %s498_s27 }
  0x32   : > { %s500_s28 = scalar_lea.hbm %s499_s27, 8  ;;  %s504_s8 = scalar_lea.hbm %s725_s3, 16 }
  0x33   : > { %232 = vmatpush.msra.mxu0 %v207_v2  ;;  %p501_p1 = scmp.ne.s32.totalorder %s499_s27, %s500_s28  ;;  %p505_p12 = scmp.lt.s32.totalorder %s499_s27, %s725_s3 }
  0x34   : > { %p506_p8 = scmp.lt.s32.totalorder %s504_s8, %s500_s28 }
  0x35   : > { %233 = vmatpush.msra.mxu0 %v206_v3  ;;  %p502_p3 = pnand %p501_p1, %p639_p13 }
  0x36   : > { %355 = vmatmul.msk.f32.vlgmr.msra.gmra.mxu0 %vm214_vm0, %v205_v4  ;;  %p507_p7 = por %p506_p8, %p505_p12 }
  0x37   : > { %p503_p5 = pneg %p502_p3 }
  0x39   : > { %p508_p9 = pnand %p507_p7, %p503_p5 }
  0xb3   : > { %v235_v6 = vpop.f32.mrf.mxu0 }
  0xb4   : > { %v236_v7 = vadd.f32 %v419_v5, %v235_v6 }
  0xb6   : > { %238 = vmax.xlane.f32.xlu0 %v236_v7 }
 0x129   : > { %v239_v8 = vpop.xlane.xlu0 %238 }
 0x12a   : > { %v240_v9 = vsub.f32 %v236_v7, %v239_v8 }
 0x12c   : > { %v241_v10 = vmul.f32 1.442695, %v240_v9 }
 0x12e   : > { %420 = vpow2.f32 %v241_v10 }
 0x134   : > { %v421_v11 = vpop.eup %420 }
 0x135   : > { %243 = vadd.xlane.f32.xlu0 %v421_v11 }
 0x1a8   : > { %v244_v12 = vpop.xlane.xlu0 %243 }
 0x1a9   : > { %422 = vrcp.f32 %v244_v12 }
 0x1af   : > { %v423_v13 = vpop.eup %422 }
 0x1b0   : > { %v246_v14 = vmul.f32 16.0, %v423_v13 }
 0x1b2   : > { %v247_v15 = vmul.f32 %v421_v11, %v246_v14 }
 0x1b4   : > { %248 = vst [vmem:[%s204_s22] sm:$0xff] %v247_v15 }
 0x1b5   : > { %511 = shalt.err (!%p508_p9)
}
 0x1b6   : > { %366 = dma.vmem_to_hbm [thread:$0]  (%p639_p13), %s263_s23, 128, %s265_s24, %s250_s25  }
 0x1b7 PF: > { %s276_s5 = sand.u32 1, %s542_s12   ;;  %p731_p10 = scmp.ge.s32.totalorder %s554_s15, 2 }
 0x1b8   : > { %s277_s11 = scalar_lea.sflag [#allocation4], %s276_s5 }
 0x1b9   : > { %p377_p11 = pnand %p731_p10, %p644_p4 }
 0x1bb   : > { %p378_p0 = pneg %p377_p11 }
 0x1bd   : > { %537 = dma.done.wait (%p378_p0), %s277_s11, 128  }
 0x1be   : > { %539 = vsyncadd (%p378_p0), %s277_s11, 4294967168  ;;  %p17_p2 = scmp.ge.s32.totalorder %s619_s26, 4   ;;  %s732_s12 = smov %s546_s13 }
 0x1bf   : > { %s733_s13 = smov %s550_s14  ;;  %s734_s14 = smov %s631_s29 }
 0x1c0   : > { %s735_s15 = smov %s619_s26  ;;  %19 = sbr.rel (!%p17_p2) target bundleno = 6 (0x6), region = 81 }
 0x1c5   :  { %283 = vsyncpa [#allocation3], 1 }
 0x1c6   :  { %285 = vsyncpa [#allocation3 + $0x1], 1 }
 0x1c7   :  { %286 = vsyncpa [#allocation6], 1 }
 0x1c8   :  { %287 = vsyncpa [#allocation4], 1 }
 0x1c9   :  { %289 = vsyncpa [#allocation4 + $0x1], 1 }

</bundles_post_ra>
